<compile_context>
chip_gen: v7x
topology: tpu7x:2x2x1
jax: 0.10.0
libtpu: 0.0.40
codegen_flags: <defaults>
</compile_context>

<pallas_src>
import jax
import jax.numpy as jnp
from jax.experimental import pallas as pl
from jax.experimental.pallas import tpu as pltpu


def _make_divisible(ch, divisor=8, min_ch=None):
    if min_ch is None:
        min_ch = divisor
    new_ch = max(min_ch, int(ch + divisor / 2) // divisor * divisor)
    if new_ch < 0.9 * ch:
        new_ch += divisor
    return new_ch


def _se_kernel_cf(x_ref, w1t_ref, b1_ref, w2t_ref, b2_ref, o_ref):
    # Channels-first block: x_ref/o_ref (BN, C, HW); HW on lanes.
    # w1t_ref: (C, Sq) f32, b1_ref: (1, Sq) f32, w2t_ref: (Sq, C) f32, b2_ref: (1, C) f32.
    inv_hw = jnp.float32(1.0 / x_ref.shape[-1])

    # Global average pool (adaptive_avg_pool2d to 1x1), f32 accumulation taken
    # directly off the ref (no long-lived full-block value).
    s = jnp.sum(x_ref[...], axis=-1, dtype=jnp.float32) * inv_hw           # (BN, C)

    # fc1 (1x1 conv == dense) + ReLU
    h = jnp.maximum(
        jnp.dot(s, w1t_ref[...], preferred_element_type=jnp.float32) + b1_ref[...],
        0.0)                                                               # (BN, Sq)

    # fc2 (1x1 conv == dense) + hardsigmoid: clip(z/6 + 0.5, 0, 1)
    z = jnp.dot(h, w2t_ref[...], preferred_element_type=jnp.float32) + b2_ref[...]
    scale = jnp.clip(z * jnp.float32(1.0 / 6.0) + 0.5, 0.0, 1.0)           # (BN, C)

    # Re-read x_ref for the store (VMEM re-read is cheap; bounds vreg pressure).
    o_ref[...] = x_ref[...] * scale.astype(o_ref.dtype)[:, :, None]


def _se_kernel_cl(x_ref, w1t_ref, b1_ref, w2t_ref, b2_ref, o_ref):
    # Channels-last block: x_ref/o_ref (BN, HW, C); C on lanes (lane-dense
    # when HW is not a multiple of 128).
    inv_hw = jnp.float32(1.0 / x_ref.shape[1])
    s = jnp.sum(x_ref[...], axis=1, dtype=jnp.float32) * inv_hw            # (BN, C)
    h = jnp.maximum(
        jnp.dot(s, w1t_ref[...], preferred_element_type=jnp.float32) + b1_ref[...],
        0.0)
    z = jnp.dot(h, w2t_ref[...], preferred_element_type=jnp.float32) + b2_ref[...]
    scale = jnp.clip(z * jnp.float32(1.0 / 6.0) + 0.5, 0.0, 1.0)           # (BN, C)
    o_ref[...] = x_ref[...] * scale.astype(o_ref.dtype)[:, None, :]


def _vmem_capacity_bytes():
    # Per-generation physical VMEM (128 MiB on v5e/v6e, 64 MiB per TC on v7x).
    try:
        return int(pltpu.get_tpu_info().vmem_capacity_bytes)
    except Exception:
        return 64 * 1024 * 1024   # conservative fallback = v7x per-TC capacity


def squeeze_excitation(x, w1, b1, w2, b2, *, block_n=None):
    """x: (N, C, H, W) NCHW. w1: (Sq, C), b1: (Sq,), w2: (C, Sq), b2: (C,)."""
    N, C, H, W = x.shape
    Sq = w1.shape[0]
    HW = H * W
    itemsize = jnp.dtype(x.dtype).itemsize

    # Lane-dense layout selection (unmasked vst on the last axis).
    channels_last = (HW % 128 != 0) and (C % 128 == 0)

    # Per-generation block budget. Live VMEM ~= 4 x block bytes (input + output
    # blocks, each double-buffered) plus tiny weight residents.
    vmem_cap = _vmem_capacity_bytes()
    per_image_bytes = max(1, C * HW * itemsize)
    weight_bytes = (2 * C * Sq + C + Sq) * 4
    if block_n is None:
        budget_bytes = max(2 * 1024 * 1024, vmem_cap // 16)
        block_n = max(1, min(N, budget_bytes // per_image_bytes))
        # Keep >= ~8 grid steps: v7x needs >=2 for its 2 TCs and every
        # generation needs several steps for double-buffered DMA overlap.
        block_n = min(block_n, max(1, pl.cdiv(N, 8)))
    grid = (pl.cdiv(N, block_n),)

    # Scoped-VMEM request sized to the pipeline's actual footprint, capped
    # comfortably under physical capacity of the smallest generation in play.
    needed = 4 * block_n * per_image_bytes + weight_bytes + (2 << 20)
    vmem_limit = int(min(max(needed, 32 * 1024 * 1024), (vmem_cap * 3) // 4))
    # TODO(synk): if a single image (block_n == 1) still exceeds the v7x budget,
    # add an HW grid axis with a partial-sum scratch (two-pass pool + scale).

    if channels_last:
        x_flat = jnp.transpose(x.reshape(N, C, HW), (0, 2, 1))   # (N, HW, C)
        kernel = _se_kernel_cl
        x_block = (block_n, HW, C)
    else:
        x_flat = x.reshape(N, C, HW)                             # (N, C, HW)
        kernel = _se_kernel_cf
        x_block = (block_n, C, HW)

    # Pre-cast parameters once in the wrapper (no per-step casts in-kernel).
    w1t = jnp.transpose(w1).astype(jnp.float32)       # (C, Sq)
    w2t = jnp.transpose(w2).astype(jnp.float32)       # (Sq, C)
    b1_2d = b1.reshape(1, Sq).astype(jnp.float32)
    b2_2d = b2.reshape(1, C).astype(jnp.float32)

    # Advisory cost hint: strictly HBM-bandwidth bound (read x + write o).
    flops = int(2 * N * C * HW + 4 * N * C * Sq)
    bytes_accessed = int(2 * N * C * HW * itemsize + weight_bytes)

    out_flat = pl.pallas_call(
        kernel,
        out_shape=jax.ShapeDtypeStruct(x_flat.shape, x.dtype),
        grid=grid,
        in_specs=[
            # x stream: tiled over batch, auto-pipelined (double-buffered).
            pl.BlockSpec(x_block, lambda i: (i, 0, 0)),
            # Weights / biases: constant index_map -> fetched once, resident.
            pl.BlockSpec((C, Sq), lambda i: (0, 0)),
            pl.BlockSpec((1, Sq), lambda i: (0, 0)),
            pl.BlockSpec((Sq, C), lambda i: (0, 0)),
            pl.BlockSpec((1, C), lambda i: (0, 0)),
        ],
        out_specs=pl.BlockSpec(x_block, lambda i: (i, 0, 0)),
        compiler_params=pltpu.CompilerParams(
            dimension_semantics=("parallel",),
            vmem_limit_bytes=vmem_limit,
        ),
        cost_estimate=pl.CostEstimate(
            flops=flops, transcendentals=0, bytes_accessed=bytes_accessed),
    )(x_flat, w1t, b1_2d, w2t, b2_2d)

    if channels_last:
        return jnp.transpose(out_flat, (0, 2, 1)).reshape(N, C, H, W)
    return out_flat.reshape(N, C, H, W)


def _reference(x, w1, b1, w2, b2):
    # Pure-JAX reference mirroring the PyTorch forward.
    s = jnp.mean(x, axis=(2, 3))                                   # (N, C)
    h = jnp.maximum(s @ w1.T + b1, 0.0)                            # (N, Sq)
    z = h @ w2.T + b2                                              # (N, C)
    scale = jnp.clip(z / 6.0 + 0.5, 0.0, 1.0)                      # hardsigmoid
    return x * scale[:, :, None, None]


if __name__ == "__main__":
    key = jax.random.PRNGKey(0)
    N, C, H, W = 2, 4, 16, 16
    Sq = _make_divisible(C // 4, 8)   # -> 8

    kx, k1, k2, k3, k4 = jax.random.split(key, 5)
    x = jax.random.normal(kx, (N, C, H, W), dtype=jnp.float32)
    # Deterministic synthetic parameters (shapes match nn.Conv2d(.., 1) weights).
    w1 = jax.random.normal(k1, (Sq, C), dtype=jnp.float32) * 0.1   # fc1.weight (Sq, C, 1, 1)
    b1 = jax.random.normal(k2, (Sq,), dtype=jnp.float32) * 0.1     # fc1.bias
    w2 = jax.random.normal(k3, (C, Sq), dtype=jnp.float32) * 0.1   # fc2.weight (C, Sq, 1, 1)
    b2 = jax.random.normal(k4, (C,), dtype=jnp.float32) * 0.1      # fc2.bias

    out = squeeze_excitation(x, w1, b1, w2, b2)
    jax.block_until_ready(out)

    ref = _reference(x, w1, b1, w2, b2)
    assert out.shape == (N, C, H, W)
    assert jnp.allclose(out, ref, atol=1e-5, rtol=1e-5), "mismatch vs reference"

    print("KERNEL_OK")
</pallas_src>

<mosaic_0001>
module attributes {stable_mosaic.version = 11 : i64} {
  func.func @_se_kernel_cf(%arg0: i32, %arg1: memref<1x4x256xf32, #tpu.memory_space<vmem>>, %arg2: memref<4x8xf32, #tpu.memory_space<vmem>>, %arg3: memref<1x8xf32, #tpu.memory_space<vmem>>, %arg4: memref<8x4xf32, #tpu.memory_space<vmem>>, %arg5: memref<1x4xf32, #tpu.memory_space<vmem>>, %arg6: memref<1x4x256xf32, #tpu.memory_space<vmem>>) attributes {dimension_semantics = [#tpu.dimension_semantics<parallel>], iteration_bounds = array<i64: 2>, scalar_prefetch = 0 : i64, scratch_operands = 0 : i64, tpu.core_type = #tpu.core_type<tc>, window_params = [{transform_indices = @transform_0, window_bounds = array<i64: 1, 4, 256>}, {pipeline_mode = #tpu.pipeline_mode<synchronous>, transform_indices = @transform_1, window_bounds = array<i64: 4, 8>}, {pipeline_mode = #tpu.pipeline_mode<synchronous>, transform_indices = @transform_2, window_bounds = array<i64: 1, 8>}, {pipeline_mode = #tpu.pipeline_mode<synchronous>, transform_indices = @transform_3, window_bounds = array<i64: 8, 4>}, {pipeline_mode = #tpu.pipeline_mode<synchronous>, transform_indices = @transform_4, window_bounds = array<i64: 1, 4>}, {transform_indices = @transform_5, window_bounds = array<i64: 1, 4, 256>}]} {
    %c0 = arith.constant 0 : index
    %c0_0 = arith.constant 0 : index
    %c0_1 = arith.constant 0 : index
    %0 = vector.load %arg1[%c0, %c0_0, %c0_1] : memref<1x4x256xf32, #tpu.memory_space<vmem>>, vector<1x4x256xf32>
    %cst = arith.constant dense<0.000000e+00> : vector<1x4xf32>
    %1 = vector.multi_reduction <add>, %0, %cst [2] : vector<1x4x256xf32> to vector<1x4xf32>
    %cst_2 = arith.constant 3.906250e-03 : f32
    %2 = vector.broadcast %cst_2 : f32 to vector<1x4xf32>
    %3 = arith.mulf %1, %2 : vector<1x4xf32>
    %c0_3 = arith.constant 0 : index
    %c0_4 = arith.constant 0 : index
    %4 = vector.load %arg2[%c0_3, %c0_4] : memref<4x8xf32, #tpu.memory_space<vmem>>, vector<4x8xf32>
    %cst_5 = arith.constant dense<0.000000e+00> : vector<1x8xf32>
    %5 = tpu.matmul %3, %4, %cst_5 {dimension_numbers = #tpu.dot_dimension_numbers<[1], [0], [0], [1], [0, 0, 1, 1], [], []>} : vector<1x4xf32>, vector<4x8xf32>, vector<1x8xf32> -> vector<1x8xf32>
    %c0_6 = arith.constant 0 : index
    %c0_7 = arith.constant 0 : index
    %6 = vector.load %arg3[%c0_6, %c0_7] : memref<1x8xf32, #tpu.memory_space<vmem>>, vector<1x8xf32>
    %7 = arith.addf %5, %6 : vector<1x8xf32>
    %cst_8 = arith.constant 0.000000e+00 : f32
    %8 = vector.broadcast %cst_8 : f32 to vector<1x8xf32>
    %9 = arith.maximumf %7, %8 : vector<1x8xf32>
    %c0_9 = arith.constant 0 : index
    %c0_10 = arith.constant 0 : index
    %10 = vector.load %arg4[%c0_9, %c0_10] : memref<8x4xf32, #tpu.memory_space<vmem>>, vector<8x4xf32>
    %cst_11 = arith.constant dense<0.000000e+00> : vector<1x4xf32>
    %11 = tpu.matmul %9, %10, %cst_11 {dimension_numbers = #tpu.dot_dimension_numbers<[1], [0], [0], [1], [0, 0, 1, 1], [], []>} : vector<1x8xf32>, vector<8x4xf32>, vector<1x4xf32> -> vector<1x4xf32>
    %c0_12 = arith.constant 0 : index
    %c0_13 = arith.constant 0 : index
    %12 = vector.load %arg5[%c0_12, %c0_13] : memref<1x4xf32, #tpu.memory_space<vmem>>, vector<1x4xf32>
    %13 = arith.addf %11, %12 : vector<1x4xf32>
    %cst_14 = arith.constant 0.166666672 : f32
    %14 = vector.broadcast %cst_14 : f32 to vector<1x4xf32>
    %15 = arith.mulf %13, %14 : vector<1x4xf32>
    %cst_15 = arith.constant 5.000000e-01 : f32
    %16 = vector.broadcast %cst_15 : f32 to vector<1x4xf32>
    %17 = arith.addf %15, %16 : vector<1x4xf32>
    %cst_16 = arith.constant 0.000000e+00 : f32
    %cst_17 = arith.constant 1.000000e+00 : f32
    %18 = vector.broadcast %cst_16 : f32 to vector<1x4xf32>
    %19 = arith.maximumf %18, %17 : vector<1x4xf32>
    %20 = vector.broadcast %cst_17 : f32 to vector<1x4xf32>
    %21 = arith.minimumf %20, %19 : vector<1x4xf32>
    %c0_18 = arith.constant 0 : index
    %c0_19 = arith.constant 0 : index
    %c0_20 = arith.constant 0 : index
    %22 = vector.load %arg1[%c0_18, %c0_19, %c0_20] : memref<1x4x256xf32, #tpu.memory_space<vmem>>, vector<1x4x256xf32>
    %23 = vector.shape_cast %21 : vector<1x4xf32> to vector<1x4x1xf32>
    %24 = vector.broadcast %23 : vector<1x4x1xf32> to vector<1x4x256xf32>
    %25 = arith.mulf %22, %24 : vector<1x4x256xf32>
    %c0_21 = arith.constant 0 : index
    %c0_22 = arith.constant 0 : index
    %c0_23 = arith.constant 0 : index
    %26 = vector.load %arg6[%c0_21, %c0_22, %c0_23] : memref<1x4x256xf32, #tpu.memory_space<vmem>>, vector<1x4x256xf32>
    tpu.vector_store %arg6[%c0_21, %c0_22, %c0_23], %25 {strides = array<i32>} : memref<1x4x256xf32, #tpu.memory_space<vmem>>, vector<1x4x256xf32>,
    return
  }
  func.func @transform_0(%arg0: i32) -> (i32, i32, i32) {
    %c0_i32 = arith.constant 0 : i32
    %c0_i32_0 = arith.constant 0 : i32
    %c0_i32_1 = arith.constant 0 : i32
    return %arg0, %c0_i32, %c0_i32_0 : i32, i32, i32
  }
  func.func @transform_1(%arg0: i32) -> (i32, i32) {
    %c0_i32 = arith.constant 0 : i32
    %c0_i32_0 = arith.constant 0 : i32
    %c0_i32_1 = arith.constant 0 : i32
    return %c0_i32, %c0_i32_0 : i32, i32
  }
  func.func @transform_2(%arg0: i32) -> (i32, i32) {
    %c0_i32 = arith.constant 0 : i32
    %c0_i32_0 = arith.constant 0 : i32
    %c0_i32_1 = arith.constant 0 : i32
    return %c0_i32, %c0_i32_0 : i32, i32
  }
  func.func @transform_3(%arg0: i32) -> (i32, i32) {
    %c0_i32 = arith.constant 0 : i32
    %c0_i32_0 = arith.constant 0 : i32
    %c0_i32_1 = arith.constant 0 : i32
    return %c0_i32, %c0_i32_0 : i32, i32
  }
  func.func @transform_4(%arg0: i32) -> (i32, i32) {
    %c0_i32 = arith.constant 0 : i32
    %c0_i32_0 = arith.constant 0 : i32
    %c0_i32_1 = arith.constant 0 : i32
    return %c0_i32, %c0_i32_0 : i32, i32
  }
  func.func @transform_5(%arg0: i32) -> (i32, i32, i32) {
    %c0_i32 = arith.constant 0 : i32
    %c0_i32_0 = arith.constant 0 : i32
    %c0_i32_1 = arith.constant 0 : i32
    return %arg0, %c0_i32, %c0_i32_0 : i32, i32, i32
  }
}

</mosaic_0001>

<bundles_post_ra>
// kernel: tpu_custom_call.1
= control target key start
LH: loop header
LB: loop body
LE: loop exit
PB: predicated region body
PF: predicated region fallthrough
CT: control target
= control target key end

     0   :  { %10 = vsyncpa [#allocation3], 0  ;;  %s914_s0 = inlined_call_operand.hbm [shape: f32[2,4,256], index: 0, kind: input, shape index: {}]   ;;  %s915_s1 = inlined_call_operand.vmem [shape: f32[4,8], index: 1, kind: input, shape index: {}]   ;;  %s916_s2 = inlined_call_operand.vmem [shape: f32[1,8], index: 2, kind: input, shape index: {}]   ;;  %s917_s3 = inlined_call_operand.vmem [shape: f32[8,4], index: 3, kind: input, shape index: {}]   ;;  %s918_s4 = inlined_call_operand.vmem [shape: f32[1,4], index: 4, kind: input, shape index: {}]   ;;  %s919_s5 = inlined_call_operand.hbm [shape: f32[2,4,256], index: 5, kind: output, shape index: {}]  }
   0x1   :  { %12 = vsyncpa [#allocation3 + $0x1], 0 }
   0x2   :  { %13 = vsyncpa [#allocation4], 0 }
   0x3   :  { %15 = vsyncpa [#allocation4 + $0x1], 0  ;;  %s737_s18 = smov 0   ;;  %s739_s19 = smov 0  }
   0x4   :  { %s741_s20 = smov 0   ;;  %s743_s21 = smov 0  }
   0x5 LB: > { %s758_s22 = sadd.s32 4294967295, %s700_s21   ;;  %s521_s23 = sadd.s32 4294967294, %s700_s21   ;;  %s700_s21 = sphi %s743_s21, %s934_s21   ;;  %s696_s20 = sphi %s741_s20, %s933_s20   ;;  %s692_s19 = sphi %s739_s19, %s932_s19   ;;  %s688_s18 = sphi %s737_s18, %s931_s18  }
   0x6   : > { %s762_s24 = sadd.s32 1, %s700_s21   ;;  %s28_s25 = sadd.s32 1, %s696_s20 }
   0x7   : > { %s25_s26 = ssub.s32 %s700_s21, %s762_s24  ;;  %p35_p0 = scmp.ne.s32.totalorder %s696_s20, %s692_s19 }
   0x8   : > { %p26_p1 = scmp.eq.s32.totalorder %s25_s26, 0  ;;  %p36_p2 = scmp.eq.s32.totalorder %s700_s21, 0 }
   0x9   : > { %p41_p3 = scmp.ne.s32.totalorder %s692_s19, %s688_s18  ;;  %p42_p4 = scmp.eq.s32.totalorder %s758_s22, 0 }
   0xa   : > { %s774_s27 = scalar_select %p26_p1, %s696_s20, %s28_s25  }
   0xb   : > { %p776_p5 = por %p36_p2, %p35_p0  ;;  %p780_p6 = por %p42_p4, %p41_p3 }
   0xc   : > { %p149_p7 = scmp.eq.s32.totalorder %s758_s22, 1  ;;  %p155_p8 = scmp.eq.s32.totalorder %s521_s23, 1 }
   0xd   : > { %p566_p10 = scmp.lt.s32.totalorder %s700_s21, 2  ;;  %s187_s7 = sand.u32 1, %s696_s20  }
   0xe   : > { %p787_p11 = por %p149_p7, %p35_p0  ;;  %p791_p12 = por %p155_p8, %p41_p3 }
   0xf   : > { %s538_s8 = sshll.u32 %s700_s21, 7  ;;  %s524_s9 = sshll.u32 %s187_s7, 3 }
  0x10   : > { %s923_s30 = scalar_select %p787_p11, 1, 0 }
  0x11   : > { %s924_s6 = scalar_select %p791_p12, 1, 0 }
  0x12   : > { %s800_s12 = scalar_lea.hbm %s914_s0, %s538_s8  ;;  %s191_s13 = scalar_lea.vmem [#allocation2], %s524_s9 }
  0x13   : > { %s199_s14 = sshll.u32 %s191_s13, 4  ;;  %p804_p13 = pnand %p566_p10, %p776_p5  ;;  %s808_s14 = int_to_ptr.vmem [resolvable:$true] %s199_s14 }
  0x14   : > { %s188_s16 = scalar_lea.sflag [#allocation3], %s187_s7  ;;  %s604_s17 = scalar_lea.hbm %s800_s12, 128 }
  0x15   : > { %p605_p2 = scmp.ne.s32.totalorder %s800_s12, %s604_s17  ;;  %p606_p3 = pneg %p804_p13 }
  0x16   : > { %s609_s26 = scalar_lea.hbm %s914_s0, 256  ;;  %p610_p5 = scmp.lt.u32.totalorder %s800_s12, %s914_s0 }
  0x17   : > { %p607_p4 = pnand %p606_p3, %p605_p2  ;;  %p611_p8 = scmp.lt.u32.totalorder %s609_s26, %s604_s17 }
  0x18   : > { %p613_p9 = scmp.lt.u32.totalorder %s604_s17, %s800_s12 }
  0x19   : > { %p608_p7 = pneg %p607_p4  ;;  %p612_p10 = por %p611_p8, %p610_p5 }
  0x1b   : > { %p614_p0 = por %p613_p9, %p612_p10 }
  0x1d   : > { %p615_p1 = pnand %p614_p0, %p608_p7 }
  0x1f   : > { %618 = shalt.err (!%p615_p1)
}
  0x20   : > { %s619_s7 = scalar_lea.vmem %s808_s14, 128  ;;  %s702_s9 = smov [#allocation2]  }
  0x21   : > { %p620_p2 = scmp.ne.s32.totalorder %s808_s14, %s619_s7  ;;  %s624_s10 = sshll.u32 %s702_s9, 4  ;;  %s625_s10 = int_to_ptr.vmem [resolvable:$false] %s624_s10 }
  0x22   : > { %s626_s11 = scalar_lea.vmem %s625_s10, 256  ;;  %p627_p11 = scmp.lt.s32.totalorder %s808_s14, %s625_s10 }
  0x23   : > { %p622_p4 = pnand %p620_p2, %p606_p3  ;;  %p628_p5 = scmp.lt.s32.totalorder %s626_s11, %s619_s7 }
  0x25   : > { %p623_p12 = pneg %p622_p4  ;;  %p629_p8 = por %p628_p5, %p627_p11 }
  0x27   : > { %p630_p9 = pnand %p629_p8, %p623_p12 }
  0x29   : > { %633 = shalt.err (!%p630_p9)
}
  0x2a   : > { %561 = dma.hbm_to_vmem [thread:$0]  (!%p804_p13), %s800_s12, 128, %s808_s14, %s188_s16  }
  0x2b   : > { %p926_p0 = scmp.lt.s32.totalorder %s700_s21, 3  ;;  %p927_p1 = scmp.ge.s32.totalorder %s700_s21, 1 }
  0x2d   : > { %p205_p3 = pnand %p927_p1, %p926_p0 }
  0x2e   : > { %s842_s13 = sand.u32 (!%p205_p3), 1, %s692_s19  }
  0x2f   : > { %208 = sbr.rel (%p205_p3) target bundleno = 780 (0x30c), region = 40  ;;  %s528_s17 = sshll.u32 (!%p205_p3), %s842_s13, 3 }
  0x30   : > { %s211_s23 = scalar_lea.sflag (!%p205_p3), [#allocation3], %s842_s13  ;;  %s214_s15 = scalar_lea.vmem (!%p205_p3), [#allocation2], %s528_s17 }
  0x36   : > { %679 = dma.done.wait (%p780_p6), %s211_s23, 128  }
  0x37   : > { %681 = vsyncadd (%p780_p6), %s211_s23, 4294967168  ;;  %vm245_vm0 = vcmask 1043456   ;;  %v241_v0 = vld [vmem:[%s214_s15] sm:$0xff]  ;;  %v703_v5 = vmov 0.0   ;;  %vm704_vm1 = vmmov 0   ;;  %v255_v7 = vlaneseq  ;;  %s539_s7 = sshll.u32 %s758_s22, 7 }
  0x38   : > { %v243_v1 = vcombine.high %v241_v0, %v241_v0  ;;  %v246_v2 = vsel %vm245_vm0, %v241_v0, 0.0  ;;  %544 = vmatprep.subr.mxu0 %v703_v5  ;;  %v252_v6 = vld [vmem:[%s915_s1] sm:$0xf]  ;;  %549 = vmatprep.subr.mxu1 %v703_v5  ;;  %vm261_vm2 = vcmask 31744   ;;  %vm340_vm3 = vcmask 64512   ;;  %s240_s9 = scalar_lea.vmem [#allocation5], %s528_s17  ;;  %s870_s15 = scalar_lea.hbm %s919_s5, %s539_s7 }
  0x39   : > { %545 = vmatpush3.msk.msra.mxu0 %vm245_vm0, %v252_v6  ;;  %546 = vmatprep.mubr.msk.f32.mxu0 %vm704_vm1, %v703_v5  ;;  %v256_v8 = vand.u32 127, %v255_v7  ;;  %v258_v9 = vshrl.u32 %v255_v7, 7  ;;  %v338_v14 = vld [vmem:[%s917_s3] sm:$0xff]  ;;  %v705_v30 = vmov 839922192   ;;  %s451_s10 = sshll.u32 %s240_s9, 4  ;;  %s872_s10 = int_to_ptr.vmem [resolvable:$true] %s451_s10 }
  0x3a   : > { %v247_v3 = vsel %vm245_vm0, %v243_v1, 0.0  ;;  %551 = vmatprep.mubr.msk.f32.mxu1 %vm704_vm1, %v703_v5  ;;  %550 = vmatpush3.msra.mxu1 %v338_v14  ;;  %v253_v15 = vld [vmem:[%s916_s2] sm:$0x1]  ;;  %v427_v31 = vunpack.c.l.s4 %v705_v30  ;;  %s437_s12 = scalar_lea.sflag [#allocation4], %s842_s13  ;;  %s634_s14 = scalar_lea.vmem %s872_s10, 128 }
  0x3b   : > { %v248_v4 = vadd.f32 %v247_v3, %v246_v2  ;;  %v259_v10 = vsub.s32 %v256_v8, %v258_v9  ;;  %v339_v20 = vld [vmem:[%s918_s4] sm:$0x1]  ;;  %v420_v27 = vsub.s32 0, %v258_v9  ;;  %p635_p6 = scmp.ne.s32.totalorder %s872_s10, %s634_s14  ;;  %p928_p11 = scmp.ne.s32.totalorder %s923_s30, 0 }
  0x3c   : > { %v428_v32 = vunpack.c.0.s8 %v427_v31  ;;  %s706_s22 = smov [#allocation5]  }
  0x3d   : > { %249 = vadd.xlane.f32.xlu0 %v248_v4  ;;  %p636_p12 = pnand %p635_p6, %p928_p11  ;;  %s638_s17 = sshll.u32 %s706_s22, 4  ;;  %s639_s17 = int_to_ptr.vmem [resolvable:$false] %s638_s17 }
  0x3e   : > { %v431_v33 = vsub.s32 %v428_v32, %v258_v9  ;;  %s640_s29 = scalar_lea.vmem %s639_s17, 256  ;;  %p641_p7 = scmp.lt.s32.totalorder %s872_s10, %s639_s17 }
  0x3f   : > { %p637_p13 = pneg %p636_p12  ;;  %p642_p10 = scmp.lt.s32.totalorder %s640_s29, %s634_s14 }
  0x41   : > { %p643_p2 = por %p642_p10, %p641_p7 }
  0x43   : > { %p644_p4 = pnand %p643_p2, %p637_p13 }
  0xca   : > { %v250_v11 = vpop.xlane.xlu0 %249 }
  0xcb   : > { %v251_v12 = vmul.f32 0.00390625, %v250_v11 }
  0xcd   : > { %v260_v13 = vrot.slane %v251_v12, %v259_v10 }
  0xcf   : > { %547 = vmatmul.mubr.msk.f32.vlgmr.msra.gmra.mrb[0].mxu0 %vm261_vm2, %v260_v13 }
 0x1a2   : > { %v333_v16 = vpop.f32.mrb[0].mxu0 }
 0x1a3   : > { %v334_v17 = vadd.f32 %v333_v16, %v253_v15  ;;  %v548_v18 = vpop.f32.mrb[1].mxu0 }
 0x1a5   : > { %v337_v19 = vmax.f32 %v334_v17, 0.0 }
 0x1a7   : > { %552 = vmatmul.mubr.msk.f32.vlgmr.msra.gmra.mrb[0].mxu1 %vm340_vm3, %v337_v19 }
 0x27a   : > { %v410_v21 = vpop.f32.mrb[0].mxu1 }
 0x27b   : > { %v411_v22 = vadd.f32 %v410_v21, %v339_v20  ;;  %v553_v23 = vpop.f32.mrb[1].mxu1 }
 0x27d   : > { %v414_v24 = vmul.f32 0.16666667, %v411_v22 }
 0x27f   : > { %v415_v25 = vadd.f32 0.5, %v414_v24 }
 0x281   : > { %v416_v26 = vmax.f32 %v415_v25, 0.0 }
 0x283   : > { %v417_v28 = vmin.f32 %v416_v26, 1.0 }
 0x285   : > { %v421_v29 = vrot.slane %v417_v28, %v420_v27 }
 0x287   : > { %423 = vbcast.lane.b32.xlu0 %v421_v29, 256 }
 0x2f9   : > { %v424_v34 = vpop.permute.xlu0 %423 }
 0x2fa   : > { %v432_v35 = vrot.slane %v424_v34, %v431_v33 }
 0x2fc   : > { %v434_v36 = vmul.f32 %v432_v35, %v241_v0 }
 0x2fe   : > { %435 = vst [vmem:[%s240_s9] sm:$0xff] %v434_v36 }
 0x2ff   : > { %647 = shalt.err (!%p644_p4)
}
 0x300   : > { %s648_s13 = scalar_lea.hbm %s870_s15, 128  ;;  %s652_s26 = scalar_lea.hbm %s919_s5, 256 }
 0x301   : > { %p649_p5 = scmp.ne.s32.totalorder %s870_s15, %s648_s13  ;;  %p653_p0 = scmp.lt.u32.totalorder %s870_s15, %s919_s5 }
 0x302   : > { %p654_p1 = scmp.lt.u32.totalorder %s652_s26, %s648_s13  ;;  %p656_p6 = scmp.lt.u32.totalorder %s648_s13, %s870_s15 }
 0x303   : > { %p650_p8 = pnand %p649_p5, %p928_p11 }
 0x304   : > { %p655_p3 = por %p654_p1, %p653_p0 }
 0x305   : > { %p651_p9 = pneg %p650_p8 }
 0x306   : > { %p657_p12 = por %p656_p6, %p655_p3 }
 0x308   : > { %p658_p13 = pnand %p657_p12, %p651_p9 }
 0x30a   : > { %661 = shalt.err (!%p658_p13)
}
 0x30b   : > { %556 = dma.vmem_to_hbm [thread:$0]  (%p928_p11), %s872_s10, 128, %s870_s15, %s437_s12  }
 0x30c PF: > { %s463_s7 = sand.u32 1, %s688_s18   ;;  %p929_p7 = scmp.ne.s32.totalorder %s924_s6, 0 }
 0x30d   : > { %p930_p10 = scmp.ge.s32.totalorder %s700_s21, 2  ;;  %s464_s9 = scalar_lea.sflag [#allocation4], %s463_s7 }
 0x30f   : > { %p563_p2 = pnand %p930_p10, %p929_p7 }
 0x311   : > { %683 = dma.done.wait (!%p563_p2), %s464_s9, 128  }
 0x312   : > { %685 = vsyncadd (!%p563_p2), %s464_s9, 4294967168  ;;  %p18_p4 = scmp.ge.s32.totalorder %s762_s24, 4   ;;  %s931_s18 = smov %s692_s19 }
 0x313   : > { %s932_s19 = smov %s696_s20  ;;  %s933_s20 = smov %s774_s27 }
 0x314   : > { %s934_s21 = smov %s762_s24  ;;  %20 = sbr.rel (!%p18_p4) target bundleno = 5 (0x5), region = 85 }
 0x31b   :  { %469 = vsyncpa [#allocation3], 1 }
 0x31c   :  { %471 = vsyncpa [#allocation3 + $0x1], 1 }
 0x31d   :  { %472 = vsyncpa [#allocation4], 1 }
 0x31e   :  { %474 = vsyncpa [#allocation4 + $0x1], 1 }

</bundles_post_ra>
